<compile_context>
chip_gen: v6e
topology: v6e:2x2x1
jax: 0.10.0
libtpu: 0.0.40
codegen_flags: <defaults>
</compile_context>

<pallas_src>
import jax
import jax.numpy as jnp
from jax.experimental import pallas as pl
from jax.experimental.pallas import tpu as pltpu


_RB = 512                          # rows per inner chunk == lane width of one output row
_DC = 512                          # feature-dim (lane) chunk for the strip-mined reduce
_X_BUFFER_BYTES = 8 * 1024 * 1024  # budget per in-flight x buffer (2 in flight)


def _round_up(v, m):
    return ((v + m - 1) // m) * m


def _choose_tiles(batch, input_dim, itemsize):
    """Pick (batch_tile, row_chunk); batch_tile is a multiple of row_chunk."""
    if batch <= _RB:
        # Single exact tile: block shape equals the full array (no partial blocks).
        return batch, batch
    rb = _RB
    # VMEM rows are lane-padded to 128, so budget on the padded row size.
    row_bytes = _round_up(input_dim, 128) * itemsize
    tb_budget = max(rb, (_X_BUFFER_BYTES // row_bytes) // rb * rb)
    # Never (much) bigger than the batch, and keep >= 2 grid steps so both v7x
    # TensorCores get work under dimension_semantics=("parallel",).
    tb_half = _round_up((batch + 1) // 2, rb)
    return min(tb_budget, tb_half), rb


def logreg_kernel(x_ref, w_ref, b_ref, o_ref):
    # x_ref: (TB, D) VMEM (streamed)      w_ref: (1, D) VMEM (grid-resident)
    # b_ref: (1, 1)  SMEM (scalar bias)   o_ref: (NC, RB) VMEM (leading tile dim squeezed)
    d = x_ref.shape[1]
    n_chunks, rb = o_ref.shape
    bias = b_ref[0, 0]

    def chunk(j, carry):
        r0 = pl.multiple_of(j * rb, rb)
        acc = jnp.zeros((rb,), jnp.float32)
        # Strip-mined dot product: static feature chunks of <= _DC lanes keep the
        # live (rb, dc) product small instead of materializing a (TB, D) temp.
        for c0 in range(0, d, _DC):
            dc = min(d, c0 + _DC) - c0
            prod = x_ref[pl.ds(r0, rb), pl.ds(c0, dc)] * w_ref[:, pl.ds(c0, dc)]
            acc = acc + jnp.sum(prod, axis=-1)          # XLU lane reduce -> (rb,)
        o_ref[j, :] = jax.nn.sigmoid(acc + bias).astype(o_ref.dtype)
        return carry

    jax.lax.fori_loop(0, n_chunks, chunk, 0)


def logistic_regression_forward(x, w, b):
    """sigmoid(x @ w.T + b) with PyTorch nn.Linear(D, 1) parameter layouts.

    x: (B, D) float32;  w: (1, D) float32 (linear.weight);  b: (1,) float32 (linear.bias)
    returns: (B, 1) float32
    """
    B, D = x.shape
    assert w.shape == (1, D), "expected PyTorch nn.Linear(D, 1) weight of shape (1, D)"

    itemsize = jnp.dtype(x.dtype).itemsize
    tb, rb = _choose_tiles(B, D, itemsize)
    assert tb % rb == 0
    n_chunks = tb // rb
    n_tiles = pl.cdiv(B, tb)

    b_smem = jnp.asarray(b, dtype=jnp.float32).reshape(1, 1)

    out = pl.pallas_call(
        logreg_kernel,
        out_shape=jax.ShapeDtypeStruct((n_tiles, n_chunks, rb), x.dtype),
        grid_spec=pltpu.PrefetchScalarGridSpec(
            num_scalar_prefetch=0,
            grid=(n_tiles,),
            in_specs=[
                pl.BlockSpec((tb, D), lambda i: (i, 0)),             # streamed x tiles (ragged tail OK)
                pl.BlockSpec((1, D), lambda i: (0, 0)),              # weight resident in VMEM
                pl.BlockSpec(memory_space=pltpu.MemorySpace.SMEM),   # bias scalar in SMEM
            ],
            out_specs=pl.BlockSpec((None, n_chunks, rb), lambda i: (i, 0, 0)),
        ),
        compiler_params=pltpu.CompilerParams(
            dimension_semantics=("parallel",),
            vmem_limit_bytes=32 * 1024 * 1024,
        ),
    )(x, w, b_smem)

    # Row-major flatten maps (tile, chunk, lane) exactly to batch order.
    return out.reshape(-1)[:B].reshape(B, 1)


if __name__ == "__main__":
    key = jax.random.PRNGKey(0)
    kx, kw, kb, kextra = jax.random.split(key, 4)

    # Primary small demo (shapes consistent with nn.Linear(input_dim, 1)).
    batch, input_dim = 8, 32
    x = jax.random.normal(kx, (batch, input_dim), dtype=jnp.float32)
    w = jax.random.normal(kw, (1, input_dim), dtype=jnp.float32) * 0.1   # PyTorch (out=1, in)
    b = jax.random.normal(kb, (1,), dtype=jnp.float32) * 0.1             # PyTorch (out=1,)

    out = jax.block_until_ready(logistic_regression_forward(x, w, b))
    ref = jax.nn.sigmoid(x @ w.T + b)
    assert out.shape == (batch, 1)
    assert jnp.allclose(out, ref, atol=1e-5), "mismatch vs reference (small case)"

    # Exercise the general tiled path: ragged last block, multi-tile, multi-chunk.
    for bb, dd in ((777, 32), (2000, 160)):
        k1, k2, k3, kextra = jax.random.split(kextra, 4)
        x2 = jax.random.normal(k1, (bb, dd), dtype=jnp.float32)
        w2 = jax.random.normal(k2, (1, dd), dtype=jnp.float32) * 0.1
        b2 = jax.random.normal(k3, (1,), dtype=jnp.float32) * 0.1
        o2 = jax.block_until_ready(logistic_regression_forward(x2, w2, b2))
        r2 = jax.nn.sigmoid(x2 @ w2.T + b2)
        assert o2.shape == (bb, 1)
        assert jnp.allclose(o2, r2, atol=1e-5), f"mismatch vs reference at B={bb}, D={dd}"

    print("KERNEL_OK")
</pallas_src>

<mosaic_0001>
module attributes {stable_mosaic.version = 11 : i64} {
  func.func @logreg_kernel(%arg0: i32, %arg1: memref<8x32xf32, #tpu.memory_space<vmem>>, %arg2: memref<1x32xf32, #tpu.memory_space<vmem>>, %arg3: memref<1x1xf32, #tpu.memory_space<smem>>, %arg4: memref<1x1x8xf32, #tpu.memory_space<vmem>>) attributes {dimension_semantics = [#tpu.dimension_semantics<parallel>], iteration_bounds = array<i64: 1>, scalar_prefetch = 0 : i64, scratch_operands = 0 : i64, tpu.core_type = #tpu.core_type<tc>, window_params = [{transform_indices = @transform_0, window_bounds = array<i64: 8, 32>}, {pipeline_mode = #tpu.pipeline_mode<synchronous>, transform_indices = @transform_1, window_bounds = array<i64: 1, 32>}, {transform_indices = @transform_2, window_bounds = array<i64: 1, 1>}, {transform_indices = @transform_3, window_bounds = array<i64: 1, 1, 8>}]} {
    %c0 = arith.constant 0 : index
    %c0_0 = arith.constant 0 : index
    %0 = memref.load %arg3[%c0, %c0_0] : memref<1x1xf32, #tpu.memory_space<smem>>
    %c0_i32 = arith.constant 0 : i32
    %c8_i32 = arith.constant 8 : i32
    %1 = arith.muli %c0_i32, %c8_i32 : i32
    %2 = tpu.assume_multiple %1, 8 : i32
    %cst = arith.constant 0.000000e+00 : f32
    %3 = vector.broadcast %cst : f32 to vector<8xf32>
    %4 = arith.index_cast %2 : i32 to index
    %c0_1 = arith.constant 0 : index
    %5 = vector.load %arg1[%4, %c0_1] : memref<8x32xf32, #tpu.memory_space<vmem>>, vector<8x32xf32>
    %c0_2 = arith.constant 0 : index
    %c0_3 = arith.constant 0 : index
    %6 = vector.load %arg2[%c0_2, %c0_3] : memref<1x32xf32, #tpu.memory_space<vmem>>, vector<1x32xf32>
    %7 = vector.broadcast %6 : vector<1x32xf32> to vector<8x32xf32>
    %8 = arith.mulf %5, %7 : vector<8x32xf32>
    %cst_4 = arith.constant dense<0.000000e+00> : vector<8xf32>
    %9 = vector.multi_reduction <add>, %8, %cst_4 [1] : vector<8x32xf32> to vector<8xf32>
    %10 = arith.addf %3, %9 : vector<8xf32>
    %11 = vector.broadcast %0 : f32 to vector<8xf32>
    %12 = arith.addf %10, %11 : vector<8xf32>
    %13 = arith.negf %12 : vector<8xf32>
    %14 = math.exp %13 : vector<8xf32>
    %cst_5 = arith.constant 1.000000e+00 : f32
    %15 = vector.broadcast %cst_5 : f32 to vector<8xf32>
    %16 = arith.addf %15, %14 : vector<8xf32>
    %17 = arith.divf %15, %16 : vector<8xf32>
    %c0_6 = arith.constant 0 : index
    %18 = arith.index_cast %c0_i32 : i32 to index
    %c0_7 = arith.constant 0 : index
    %19 = vector.load %arg4[%c0_6, %18, %c0_7] : memref<1x1x8xf32, #tpu.memory_space<vmem>>, vector<1x1x8xf32>
    %20 = vector.shape_cast %19 : vector<1x1x8xf32> to vector<8xf32>
    %21 = vector.shape_cast %17 : vector<8xf32> to vector<1x1x8xf32>
    tpu.vector_store %arg4[%c0_6, %18, %c0_7], %21 {strides = array<i32>} : memref<1x1x8xf32, #tpu.memory_space<vmem>>, vector<1x1x8xf32>,
    %c1_i32 = arith.constant 1 : i32
    return
  }
  func.func @transform_0(%arg0: i32) -> (i32, i32) {
    %c0_i32 = arith.constant 0 : i32
    %c0_i32_0 = arith.constant 0 : i32
    return %arg0, %c0_i32 : i32, i32
  }
  func.func @transform_1(%arg0: i32) -> (i32, i32) {
    %c0_i32 = arith.constant 0 : i32
    %c0_i32_0 = arith.constant 0 : i32
    %c0_i32_1 = arith.constant 0 : i32
    return %c0_i32, %c0_i32_0 : i32, i32
  }
  func.func @transform_2(%arg0: i32) -> (i32, i32) {
    %c0_i32 = arith.constant 0 : i32
    %c0_i32_0 = arith.constant 0 : i32
    %c0_i32_1 = arith.constant 0 : i32
    return %c0_i32, %c0_i32_0 : i32, i32
  }
  func.func @transform_3(%arg0: i32) -> (i32, i32, i32) {
    %c0_i32 = arith.constant 0 : i32
    %c0_i32_0 = arith.constant 0 : i32
    %c0_i32_1 = arith.constant 0 : i32
    return %arg0, %c0_i32, %c0_i32_0 : i32, i32, i32
  }
}

</mosaic_0001>

<bundles_post_ra>
// kernel: tpu_custom_call.1
= control target key start
LH: loop header
LB: loop body
LE: loop exit
PB: predicated region body
PF: predicated region fallthrough
CT: control target
= control target key end

     0   :  { %9 = vsyncpa [#allocation4], 0  ;;  %s162_s0 = inlined_call_operand.hbm [shape: f32[8,32], index: 0, kind: input, shape index: {}]   ;;  %s163_s1 = inlined_call_operand.vmem [shape: f32[1,32], index: 1, kind: input, shape index: {}]   ;;  %s164_s2 = inlined_call_operand.<no memory space> [shape: f32[1,1], index: 2, kind: input, shape index: {}]   ;;  %s165_s3 = inlined_call_operand.hbm [shape: f32[1,1,8], index: 3, kind: output, shape index: {}]  }
   0x1   :  { %10 = vsyncpa [#allocation5], 0  ;;  %s128_s12 = smov [#allocation3]  }
   0x2   :  { %s17_s13 = sshll.u32 %s128_s12, 4  ;;  %s18_s13 = int_to_ptr.vmem [resolvable:$true] %s17_s13 }
   0x3   :  { %s92_s14 = scalar_lea.vmem %s18_s13, 128  ;;  %p97_p1 = scmp.lt.s32.totalorder %s18_s13, %s18_s13 }
   0x4   :  { %p93_p0 = scmp.ne.s32.totalorder %s18_s13, %s92_s14  ;;  %p98_p2 = scmp.lt.s32.totalorder %s92_s14, %s92_s14 }
   0x6   :  { %p99_p3 = por %p98_p2, %p97_p1 }
   0x8   :  { %p100_p4 = pnand %p99_p3, %p93_p0 }
   0xa   :  { %103 = shalt.err (!%p100_p4)
}
   0xb   :  { %20 = dma.hbm_to_vmem [thread:$0]  %s162_s0, 128, %s18_s13, [#allocation4]  }
   0xc   :  { %124 = dma.done.wait [#allocation4], 128  }
   0xd   :  { %125 = vsyncadd [#allocation4], 4294967168  ;;  %v29_v0 = vld [vmem:[#allocation3] sm:$0xff]  ;;  %vm38_vm0 = vcmask 261120   ;;  %v43_v4 = vstv %s164_s2  ;;  %v52_v10 = vlaneseq  ;;  %s129_s0 = smov [#allocation6]   ;;  %vm59_vm1 = vcmask 57344  }
   0xe   :  { %v76_v1 = vld [vmem:[%s163_s1] ss:$0 sm:$0xff]  ;;  %s67_s1 = sshll.u32 %s129_s0, 4  ;;  %s68_s1 = int_to_ptr.vmem [resolvable:$true] %s67_s1 }
   0xf   :  { %v37_v2 = vmul.f32 %v76_v1, %v29_v0  ;;  %v53_v11 = vand.u32 127, %v52_v10  ;;  %v55_v12 = vshrl.u32 %v52_v10, 7  ;;  %s104_s21 = scalar_lea.vmem %s68_s1, 16  ;;  %s108_s2 = scalar_lea.vmem %s68_s1, 32 }
  0x10   :  { %p105_p5 = scmp.ne.s32.totalorder %s68_s1, %s104_s21  ;;  %p109_p6 = scmp.lt.s32.totalorder %s68_s1, %s68_s1 }
  0x11   :  { %v39_v3 = vsel %vm38_vm0, %v37_v2, 0.0  ;;  %v56_v13 = vsub.s32 %v53_v11, %v55_v12  ;;  %p110_p7 = scmp.lt.s32.totalorder %s108_s2, %s104_s21 }
  0x12   :  { %40 = vadd.xlane.f32.xlu0 %v39_v3 }
  0x13   :  { %p111_p8 = por %p110_p7, %p109_p6 }
  0x15   :  { %p112_p9 = pnand %p111_p8, %p105_p5 }
  0x9b   :  { %v41_v5 = vpop.xlane.xlu0 %40 }
  0x9c   :  { %v44_v6 = vadd.f32 %v43_v4, %v41_v5 }
  0x9e   :  { %v77_v7 = vmul.f32 -1.442695, %v44_v6 }
  0xa0   :  { %80 = vpow2.f32 %v77_v7 }
  0xad   :  { %v81_v8 = vpop.eup %80 }
  0xae   :  { %v48_v9 = vadd.f32 1.0, %v81_v8 }
  0xb0   :  { %82 = vrcp.f32 %v48_v9 }
  0xbd   :  { %v83_v14 = vpop.eup %82 }
  0xbe   :  { %v57_v15 = vrot.slane %v83_v14, %v56_v13 }
  0xc0   :  { %60 = vst.msk [vmem:[#allocation6] sm:$0x1] %vm59_vm1, %v57_v15 }
  0xc1   :  { %115 = shalt.err (!%p112_p9)
}
  0xc2   :  { %70 = dma.vmem_to_hbm [thread:$0]  %s68_s1, 16, %s165_s3, [#allocation5]  }
  0xc3   :  { %126 = dma.done.wait [#allocation5], 16  }
  0xc4   :  { %127 = vsyncadd [#allocation5], 4294967280 }
  0xc5   :  { %74 = vsyncpa [#allocation4], 1 }
  0xc6   :  { %75 = vsyncpa [#allocation5], 1 }

</bundles_post_ra>
